<compile_context>
chip_gen: v7x
topology: tpu7x:2x2x1
jax: 0.10.0
libtpu: 0.0.40
codegen_flags: <defaults>
</compile_context>

<pallas_src>
import functools
import math

import jax
import jax.numpy as jnp
from jax.experimental import pallas as pl
from jax.experimental.pallas import tpu as pltpu


def _rmsnorm_kernel(x_ref, w_ref, o_ref, *, eps: float, inv_d: float,
                    low_precision_tail: bool):
    # x_ref: (TILE_ROWS, D), w_ref: (1, D), o_ref: (TILE_ROWS, D)
    x = x_ref[...]
    xf = x.astype(jnp.float32)
    ss = jnp.sum(xf * xf, axis=-1, keepdims=True)      # f32 sum of squares (XLU reduce)
    norm = jax.lax.rsqrt(ss * inv_d + eps)              # f32 rsqrt on EUP
    if low_precision_tail:
        # bf16 tail (v6e/v7x): reduction + rsqrt stay f32; scale applied in bf16.
        o_ref[...] = (x * norm.astype(x.dtype)
                      * w_ref[...].astype(x.dtype)).astype(o_ref.dtype)
    else:
        # All-f32 tail (v5e: no bf16 VALU; and any f32 input).
        o_ref[...] = (xf * norm * w_ref[...].astype(jnp.float32)).astype(o_ref.dtype)


_MIB = 1024 * 1024


@functools.lru_cache(maxsize=1)
def _chip_info():
    """Return (block_budget_bytes, vmem_limit_bytes, has_bf16_valu), generation-aware."""
    vmem_cap = None
    has_bf16_valu = True
    try:
        info = pltpu.get_tpu_info()
        vmem_cap = getattr(info, "vmem_capacity_bytes", None)
    except Exception:
        vmem_cap = None

    kind = ""
    try:
        kind = jax.devices()[0].device_kind.lower()
    except Exception:
        pass

    if ("v5e" in kind) or ("v5 lite" in kind) or ("v5litepod" in kind):
        has_bf16_valu = False                      # v5e: no bf16 VALU -> keep f32 tail
        if vmem_cap is None:
            vmem_cap = 128 * _MIB
    elif "v6" in kind:
        if vmem_cap is None:
            vmem_cap = 128 * _MIB
    if vmem_cap is None:
        vmem_cap = 64 * _MIB                       # conservative (v7x-sized VMEM)
    vmem_cap = max(64 * _MIB, min(int(vmem_cap), 128 * _MIB))

    vmem_limit = int(vmem_cap * 0.78)              # headroom: weight bufs, sems, scratch
    block_budget = int(vmem_limit * 0.65)          # tile-dependent (double-buffered) part
    return block_budget, vmem_limit, has_bf16_valu


def _pick_tile_rows(rows: int, d_model: int, itemsize: int, block_budget: int) -> int:
    """Bytes-budget-driven row tile, sublane-aligned, grid shaped for megacore."""
    pack = max(8, 32 // itemsize)          # f32 -> 8, bf16 -> 16, int8/fp8 -> 32
    if rows <= pack:
        return rows                        # one full-rows block (always legal)
    rows_ceil = pl.cdiv(rows, pack) * pack

    # Per-row VMEM footprint: double-buffered (2x) input + output blocks, plus
    # one f32 temporary per element for the in-kernel compute.
    per_row_vmem = d_model * (4 * itemsize + 4)
    tile = max(pack, block_budget // per_row_vmem)
    tile = min(tile, 8192, rows_ceil)      # bytes-based cap; no fixed 1024-row ceiling
    tile = max(pack, (tile // pack) * pack)

    # Megacore grid shaping (v7x): prefer an even step count >= 4 when rows
    # allow, so both TensorCores get balanced, pipelined work.  Near-free on
    # single-TC chips (blocks only shrink when the whole problem is small).
    if rows_ceil >= 4 * pack:
        n = pl.cdiv(rows_ceil, tile)
        if n < 4 or (n % 2 != 0 and n < 16):
            start = 4 if n < 4 else n + 1
            if start % 2:
                start += 1
            max_steps = rows_ceil // pack
            for t in range(start, min(max_steps, start + 32) + 1, 2):
                cand = max(pack, pl.cdiv(pl.cdiv(rows_ceil, t), pack) * pack)
                steps = pl.cdiv(rows_ceil, cand)
                if steps >= 4 and steps % 2 == 0:
                    tile = cand
                    break

    if tile >= rows:
        tile = rows                        # single full-rows block (always legal)
    return tile


def rmsnorm(x: jax.Array, weight: jax.Array, eps: float = 1e-6,
            tile_rows: int | None = None) -> jax.Array:
    """RMSNorm over the last axis of x, scaled by weight (shape (d_model,))."""
    orig_shape = x.shape
    d_model = orig_shape[-1]
    rows = int(math.prod(orig_shape[:-1]))
    itemsize = jnp.dtype(x.dtype).itemsize

    block_budget, vmem_limit, has_bf16_valu = _chip_info()
    if tile_rows is None:
        tile_rows = _pick_tile_rows(rows, d_model, itemsize, block_budget)

    low_precision_tail = bool(has_bf16_valu and x.dtype == jnp.bfloat16)

    x2d = x.reshape(rows, d_model)
    w2d = weight.reshape(1, d_model)

    grid = (pl.cdiv(rows, tile_rows),)     # no input padding; ragged tail is masked

    cost = pl.CostEstimate(
        flops=4 * rows * d_model,          # square, reduce-add, two multiplies
        transcendentals=rows,
        bytes_accessed=2 * rows * d_model * itemsize
        + d_model * jnp.dtype(weight.dtype).itemsize,
    )

    out = pl.pallas_call(
        functools.partial(
            _rmsnorm_kernel, eps=float(eps), inv_d=1.0 / d_model,
            low_precision_tail=low_precision_tail),
        out_shape=jax.ShapeDtypeStruct((rows, d_model), x.dtype),
        grid_spec=pltpu.PrefetchScalarGridSpec(
            num_scalar_prefetch=0,
            grid=grid,
            in_specs=[
                pl.BlockSpec((tile_rows, d_model), lambda i: (i, 0)),
                pl.BlockSpec((1, d_model), lambda i: (0, 0)),
            ],
            out_specs=pl.BlockSpec((tile_rows, d_model), lambda i: (i, 0)),
        ),
        compiler_params=pltpu.CompilerParams(
            dimension_semantics=("parallel",),
            vmem_limit_bytes=vmem_limit,
        ),
        cost_estimate=cost,
    )(x2d, w2d)

    return out.reshape(orig_shape)


def rmsnorm_ref(x, weight, eps=1e-6):
    xf = x.astype(jnp.float32)
    norm = jax.lax.rsqrt(jnp.mean(xf * xf, axis=-1, keepdims=True) + eps)
    return (xf * norm * weight.astype(jnp.float32)).astype(x.dtype)


if __name__ == "__main__":
    key = jax.random.PRNGKey(0)
    kx, kw, kx2, kx3, kw3 = jax.random.split(key, 5)

    # Case 1: small (batch, seq, d_model) shape matching the module's use.
    batch, seq, d_model = 2, 8, 32
    x = jax.random.normal(kx, (batch, seq, d_model), dtype=jnp.float32)
    weight = 1.0 + 0.1 * jax.random.normal(kw, (d_model,), dtype=jnp.float32)
    out = rmsnorm(x, weight, eps=1e-6)
    jax.block_until_ready(out)
    ref = rmsnorm_ref(x, weight, eps=1e-6)
    assert out.shape == x.shape and out.dtype == x.dtype
    assert jnp.allclose(out, ref, atol=1e-5, rtol=1e-5)

    # Case 2: ragged row count exercises the no-pad / masked-tail path.
    x2 = jax.random.normal(kx2, (5, 4, 128), dtype=jnp.float32)
    w2 = jnp.ones((128,), dtype=jnp.float32)
    out2 = rmsnorm(x2, w2, eps=1e-6)
    jax.block_until_ready(out2)
    ref2 = rmsnorm_ref(x2, w2, eps=1e-6)
    assert jnp.allclose(out2, ref2, atol=1e-5, rtol=1e-5)

    # Case 3: bf16 input exercises the low-precision tail (f32 reduction kept).
    x3 = jax.random.normal(kx3, (3, 16, 256), dtype=jnp.bfloat16)
    w3 = (1.0 + 0.1 * jax.random.normal(kw3, (256,), dtype=jnp.float32)).astype(jnp.bfloat16)
    out3 = rmsnorm(x3, w3, eps=1e-6)
    jax.block_until_ready(out3)
    ref3 = rmsnorm_ref(x3, w3, eps=1e-6)
    assert out3.shape == x3.shape and out3.dtype == x3.dtype
    assert jnp.allclose(out3.astype(jnp.float32), ref3.astype(jnp.float32),
                        atol=5e-2, rtol=5e-2)

    print("KERNEL_OK")
</pallas_src>

<mosaic_0001>
module attributes {stable_mosaic.version = 11 : i64} {
  func.func @_rmsnorm_kernel(%arg0: i32, %arg1: memref<16x32xf32, #tpu.memory_space<vmem>>, %arg2: memref<1x32xf32, #tpu.memory_space<vmem>>, %arg3: memref<16x32xf32, #tpu.memory_space<vmem>>) attributes {dimension_semantics = [#tpu.dimension_semantics<parallel>], iteration_bounds = array<i64: 1>, scalar_prefetch = 0 : i64, scratch_operands = 0 : i64, tpu.core_type = #tpu.core_type<tc>, window_params = [{transform_indices = @transform_0, window_bounds = array<i64: 16, 32>}, {pipeline_mode = #tpu.pipeline_mode<synchronous>, transform_indices = @transform_1, window_bounds = array<i64: 1, 32>}, {transform_indices = @transform_2, window_bounds = array<i64: 16, 32>}]} {
    %c0 = arith.constant 0 : index
    %c0_0 = arith.constant 0 : index
    %0 = vector.load %arg1[%c0, %c0_0] : memref<16x32xf32, #tpu.memory_space<vmem>>, vector<16x32xf32>
    %1 = arith.mulf %0, %0 : vector<16x32xf32>
    %cst = arith.constant dense<0.000000e+00> : vector<16xf32>
    %2 = vector.multi_reduction <add>, %1, %cst [1] : vector<16x32xf32> to vector<16xf32>
    %3 = vector.shape_cast %2 : vector<16xf32> to vector<16x1xf32>
    %cst_1 = arith.constant 3.125000e-02 : f32
    %4 = vector.broadcast %cst_1 : f32 to vector<16x1xf32>
    %5 = arith.mulf %3, %4 : vector<16x1xf32>
    %cst_2 = arith.constant 9.99999997E-7 : f32
    %6 = vector.broadcast %cst_2 : f32 to vector<16x1xf32>
    %7 = arith.addf %5, %6 : vector<16x1xf32>
    %8 = math.rsqrt %7 : vector<16x1xf32>
    %9 = vector.broadcast %8 : vector<16x1xf32> to vector<16x32xf32>
    %10 = arith.mulf %0, %9 : vector<16x32xf32>
    %c0_3 = arith.constant 0 : index
    %c0_4 = arith.constant 0 : index
    %11 = vector.load %arg2[%c0_3, %c0_4] : memref<1x32xf32, #tpu.memory_space<vmem>>, vector<1x32xf32>
    %12 = vector.broadcast %11 : vector<1x32xf32> to vector<16x32xf32>
    %13 = arith.mulf %10, %12 : vector<16x32xf32>
    %c0_5 = arith.constant 0 : index
    %c0_6 = arith.constant 0 : index
    %14 = vector.load %arg3[%c0_5, %c0_6] : memref<16x32xf32, #tpu.memory_space<vmem>>, vector<16x32xf32>
    tpu.vector_store %arg3[%c0_5, %c0_6], %13 {strides = array<i32>} : memref<16x32xf32, #tpu.memory_space<vmem>>, vector<16x32xf32>,
    return
  }
  func.func @transform_0(%arg0: i32) -> (i32, i32) {
    %c0_i32 = arith.constant 0 : i32
    %c0_i32_0 = arith.constant 0 : i32
    return %arg0, %c0_i32 : i32, i32
  }
  func.func @transform_1(%arg0: i32) -> (i32, i32) {
    %c0_i32 = arith.constant 0 : i32
    %c0_i32_0 = arith.constant 0 : i32
    %c0_i32_1 = arith.constant 0 : i32
    return %c0_i32, %c0_i32_0 : i32, i32
  }
  func.func @transform_2(%arg0: i32) -> (i32, i32) {
    %c0_i32 = arith.constant 0 : i32
    %c0_i32_0 = arith.constant 0 : i32
    return %arg0, %c0_i32 : i32, i32
  }
}

</mosaic_0001>

<bundles_post_ra>
// kernel: tpu_custom_call.1
= control target key start
LH: loop header
LB: loop body
LE: loop exit
PB: predicated region body
PF: predicated region fallthrough
CT: control target
= control target key end

     0   :  { %7 = vsyncpa [#allocation3], 0  ;;  %s186_s0 = inlined_call_operand.hbm [shape: f32[16,32], index: 0, kind: input, shape index: {}]   ;;  %s187_s1 = inlined_call_operand.vmem [shape: f32[1,32], index: 1, kind: input, shape index: {}]   ;;  %s188_s2 = inlined_call_operand.hbm [shape: f32[16,32], index: 2, kind: output, shape index: {}]  }
   0x1   :  { %8 = vsyncpa [#allocation4], 0  ;;  %s130_s9 = smov [#allocation2]   ;;  %s82_s13 = scalar_lea.hbm %s186_s0, 256 }
   0x2   :  { %s14_s10 = sshll.u32 %s130_s9, 4  ;;  %p83_p0 = scmp.ne.s32.totalorder %s186_s0, %s82_s13  ;;  %s15_s10 = int_to_ptr.vmem [resolvable:$true] %s14_s10 }
   0x3   :  { %p86_p1 = scmp.lt.u32.totalorder %s82_s13, %s186_s0 }
   0x5   :  { %p88_p2 = pnand %p86_p1, %p83_p0 }
   0x7   :  { %91 = shalt.err (!%p88_p2)
}
   0x8   :  { %s92_s18 = scalar_lea.vmem %s15_s10, 256  ;;  %p97_p4 = scmp.lt.s32.totalorder %s15_s10, %s15_s10 }
   0x9   :  { %p93_p3 = scmp.ne.s32.totalorder %s15_s10, %s92_s18  ;;  %p98_p5 = scmp.lt.s32.totalorder %s92_s18, %s92_s18 }
   0xb   :  { %p99_p6 = por %p98_p5, %p97_p4 }
   0xd   :  { %p100_p7 = pnand %p99_p6, %p93_p3 }
   0xf   :  { %103 = shalt.err (!%p100_p7)
}
  0x10   :  { %s131_s19 = smov 128   ;;  %s132_s20 = smov 8  }
  0x11   :  { %20 = dma.hbm_to_vmem [thread:$0]  %s186_s0, 256, %s15_s10, [#allocation3], %s131_s19, %s131_s19, %s132_s20  }
  0x12   :  { %126 = dma.done.wait [#allocation3], 256  }
  0x13   :  { %127 = vsyncadd [#allocation3], 4294967040  ;;  %v26_v0 = vld [vmem:[#allocation2] sm:$0xff]  ;;  %vm30_vm0 = vcmask 261120   ;;  %v27_v1 = vld [vmem:[#allocation2 + $0x8] sm:$0xff]  ;;  %s133_s24 = smov [#allocation5]  }
  0x14   :  { %v28_v2 = vmul.f32 %v26_v0, %v26_v0  ;;  %v29_v3 = vmul.f32 %v27_v1, %v27_v1  ;;  %v73_v13 = vld [vmem:[%s187_s1] ss:$0 sm:$0xff]  ;;  %s61_s25 = sshll.u32 %s133_s24, 4  ;;  %s62_s25 = int_to_ptr.vmem [resolvable:$true] %s61_s25 }
  0x15   :  { %s104_s26 = scalar_lea.vmem %s62_s25, 256  ;;  %p109_p9 = scmp.lt.s32.totalorder %s62_s25, %s62_s25 }
  0x16   :  { %v31_v4 = vsel %vm30_vm0, %v28_v2, 0.0  ;;  %v34_v5 = vsel %vm30_vm0, %v29_v3, 0.0  ;;  %p105_p8 = scmp.ne.s32.totalorder %s62_s25, %s104_s26  ;;  %p110_p10 = scmp.lt.s32.totalorder %s104_s26, %s104_s26 }
  0x17   :  { %32 = vadd.xlane.f32.xlu0 %v31_v4 }
  0x18   :  { %p111_p11 = por %p110_p10, %p109_p9 }
  0x1a   :  { %p112_p12 = pnand %p111_p11, %p105_p8 }
  0x1b   :  { %35 = vadd.xlane.f32.xlu0 %v34_v5 }
  0xa4   :  { %v33_v6 = vpop.xlane.xlu0 %32 }
  0xa5   :  { %v37_v7 = vmul.f32 0.03125, %v33_v6 }
  0xa7   :  { %v39_v8 = vadd.f32 1e-06, %v37_v7 }
  0xa8   :  { %v36_v9 = vpop.xlane.xlu0 %35 }
  0xa9   :  { %78 = vrsqrt.f32 %v39_v8  ;;  %v38_v10 = vmul.f32 0.03125, %v36_v9 }
  0xab   :  { %v40_v11 = vadd.f32 1e-06, %v38_v10 }
  0xad   :  { %80 = vrsqrt.f32 %v40_v11 }
  0xb3   :  { %v79_v12 = vpop.eup %78 }
  0xb4   :  { %v43_v14 = vmul.f32 %v79_v12, %v26_v0 }
  0xb6   :  { %v52_v15 = vmul.f32 %v73_v13, %v43_v14 }
  0xb7   :  { %v81_v16 = vpop.eup %80 }
  0xb8   :  { %v44_v17 = vmul.f32 %v81_v16, %v27_v1  ;;  %54 = vst.msk [vmem:[#allocation5] sm:$0xff] %vm30_vm0, %v52_v15 }
  0xba   :  { %v53_v18 = vmul.f32 %v73_v13, %v44_v17 }
  0xbc   :  { %55 = vst.msk [vmem:[#allocation5 + $0x8] sm:$0xff] %vm30_vm0, %v53_v18 }
  0xbd   :  { %115 = shalt.err (!%p112_p12)
}
  0xbe   :  { %s116_s28 = scalar_lea.hbm %s188_s2, 256 }
  0xbf   :  { %p117_p13 = scmp.ne.s32.totalorder %s188_s2, %s116_s28  ;;  %p120_p0 = scmp.lt.u32.totalorder %s116_s28, %s188_s2 }
  0xc1   :  { %p122_p1 = pnand %p120_p0, %p117_p13 }
  0xc3   :  { %125 = shalt.err (!%p122_p1)
}
  0xc4   :  { %67 = dma.vmem_to_hbm [thread:$0]  %s62_s25, 256, %s188_s2, [#allocation4], %s131_s19, %s131_s19, %s132_s20  }
  0xc5   :  { %128 = dma.done.wait [#allocation4], 256  }
  0xc6   :  { %129 = vsyncadd [#allocation4], 4294967040 }
  0xc7   :  { %71 = vsyncpa [#allocation3], 1 }
  0xc8   :  { %72 = vsyncpa [#allocation4], 1 }

</bundles_post_ra>
